<compile_context>
chip_gen: v6e
topology: v6e:2x2x1
jax: 0.10.0
libtpu: 0.0.40
codegen_flags: <defaults>
</compile_context>

<pallas_src>
import jax
import jax.numpy as jnp
from jax.experimental import pallas as pl
from jax.experimental.pallas import tpu as pltpu


def _round_up(x, m):
    return (x + m - 1) // m * m


def _predictor_kernel(x_ref, w_ref, b_ref, o_ref, acc_ref):
    """Row-tile x K-tile fused linear: acc += x @ W; out = acc + b at last K."""
    k = pl.program_id(1)

    @pl.when(k == 0)
    def _():
        acc_ref[...] = jnp.zeros_like(acc_ref)

    acc_ref[...] += jnp.dot(x_ref[...], w_ref[...],
                            preferred_element_type=jnp.float32)

    @pl.when(k == pl.num_programs(1) - 1)
    def _():
        o_ref[...] = (acc_ref[...] + b_ref[...]).astype(o_ref.dtype)


def fuse_params(w_cls, b_cls, w_bbox, b_bbox, *, dtype=jnp.bfloat16):
    """One-time param prep: transpose, fuse the two heads, pad lanes to 128.

    w_cls:  (nc, IN)   b_cls:  (nc,)     (PyTorch nn.Linear layout)
    w_bbox: (nb, IN)   b_bbox: (nb,)
    Returns (w_fused (IN, out_pad) in `dtype`, b_fused (1, out_pad) f32, nc, nb).
    """
    nc = w_cls.shape[0]
    nb = w_bbox.shape[0]
    out = nc + nb
    out_pad = _round_up(out, 128)   # do NOT widen further: kernel is x-BW-bound

    w = jnp.concatenate([w_cls.T, w_bbox.T], axis=1)           # (IN, nc+nb)
    b = jnp.concatenate([b_cls, b_bbox]).reshape(1, out)        # (1,  nc+nb)
    w = jnp.pad(w, ((0, 0), (0, out_pad - out)))
    b = jnp.pad(b, ((0, 0), (0, out_pad - out))).astype(jnp.float32)
    if dtype is not None:
        w = w.astype(dtype)                                     # bf16 weights
    return w, b, nc, nb


def _pick_tk(in_features):
    """K tile: full-K residency for small IN; even divisor >=128 for large IN."""
    if in_features < 4096:
        return in_features
    for tk in (2048, 1024, 512, 256, 128):
        if in_features % tk == 0:
            return tk
    return in_features   # odd IN not 128-divisible: keep full K resident


def fast_rcnn_predictor(x_nchw, w_fused, b_fused, nc, nb, *, tm=None):
    """x_nchw: (N, C, H, W); w_fused/b_fused from fuse_params (pre-fused)."""
    n = x_nchw.shape[0]
    # flatten(start_dim=1) + enforce matching matmul dtypes (bf16 x bf16).
    x2d = x_nchw.reshape(n, -1).astype(w_fused.dtype)
    in_features = x2d.shape[1]
    out_pad = w_fused.shape[1]

    # Row tile: small N -> a single full-extent block (no row padding needed,
    # full-dim blocks are exempt from the (8,128) rule).  Larger N -> at least
    # 2 grid steps so v7x's second TensorCore gets work; multiple of 16 keeps
    # bf16 sublane packing aligned; cap 512 bounds VMEM on v7x / v5e.
    if tm is None:
        if n <= 32:
            tm = n
        else:
            tm = min(512, _round_up(pl.cdiv(n, 2), 16))
    grid_m = pl.cdiv(n, tm)

    tk = _pick_tk(in_features)
    grid_k = in_features // tk        # _pick_tk guarantees exact division

    x_itm = jnp.dtype(x2d.dtype).itemsize
    w_itm = jnp.dtype(w_fused.dtype).itemsize

    # Weights / bias are grid-invariant along the row axis; when K is not
    # tiled they never change at all -> a single VMEM buffer suffices.
    if grid_k == 1:
        w_spec = pl.BlockSpec((tk, out_pad), lambda i, k: (k, 0),
                              pipeline_mode=pl.Buffered(1))
    else:
        w_spec = pl.BlockSpec((tk, out_pad), lambda i, k: (k, 0))
    b_spec = pl.BlockSpec((1, out_pad), lambda i, k: (0, 0),
                          pipeline_mode=pl.Buffered(1))

    # Raise the scoped VMEM limit only when the working set needs it
    # (large-IN box-head config on v5e's 16 MiB default).
    vmem_bytes = (2 * tm * tk * x_itm                              # x (dbuf)
                  + (1 if grid_k == 1 else 2) * tk * out_pad * w_itm
                  + out_pad * 4                                    # bias
                  + 2 * tm * out_pad * 4                           # out (dbuf)
                  + tm * out_pad * 4)                              # accumulator
    vmem_limit = None
    if vmem_bytes > 12 * 1024 * 1024:
        vmem_limit = min(int(vmem_bytes * 1.5) + (4 << 20), 100 * 1024 * 1024)

    cost = pl.CostEstimate(
        flops=2 * n * in_features * out_pad,
        transcendentals=0,
        bytes_accessed=(n * in_features * x_itm
                        + in_features * out_pad * w_itm
                        + out_pad * 4
                        + n * out_pad * 4))

    out = pl.pallas_call(
        _predictor_kernel,
        out_shape=jax.ShapeDtypeStruct((n, out_pad), jnp.float32),  # f32 outputs
        grid=(grid_m, grid_k),
        in_specs=[
            pl.BlockSpec((tm, tk), lambda i, k: (i, k)),   # x rows: tiled
            w_spec,                                        # fused weights
            b_spec,                                        # fused bias
        ],
        out_specs=pl.BlockSpec((tm, out_pad), lambda i, k: (i, 0)),
        scratch_shapes=[pltpu.VMEM((tm, out_pad), jnp.float32)],
        compiler_params=pltpu.CompilerParams(
            dimension_semantics=("parallel", "arbitrary"),
            vmem_limit_bytes=vmem_limit),
        cost_estimate=cost,
    )(x2d, w_fused, b_fused)

    # Split the fused heads apart (cheap XLA slices); partial-row garbage (if
    # any) never reaches `out` because Pallas masks the boundary-block store.
    cls_score = out[:, :nc]
    bbox_pred = out[:, nc:nc + nb]
    return cls_score, bbox_pred


def init_params(key, in_channels, num_classes):
    """Deterministic nn.Linear-style init (uniform +/- 1/sqrt(in_features))."""
    k1, k2, k3, k4 = jax.random.split(key, 4)
    bound = 1.0 / jnp.sqrt(jnp.float32(in_channels))
    w_cls = jax.random.uniform(k1, (num_classes, in_channels),
                               jnp.float32, -bound, bound)
    b_cls = jax.random.uniform(k2, (num_classes,), jnp.float32, -bound, bound)
    w_bbox = jax.random.uniform(k3, (num_classes * 2, in_channels),
                                jnp.float32, -bound, bound)
    b_bbox = jax.random.uniform(k4, (num_classes * 2,),
                                jnp.float32, -bound, bound)
    return w_cls, b_cls, w_bbox, b_bbox


if __name__ == "__main__":
    key = jax.random.PRNGKey(0)
    k_x, k_p = jax.random.split(key)

    # Small example: N=2, C=4, H=W=16  ->  in_channels = 4*16*16 = 1024
    N, C, H, W = 2, 4, 16, 16
    num_classes = 8
    in_channels = C * H * W

    x = jax.random.normal(k_x, (N, C, H, W), jnp.float32)
    w_cls, b_cls, w_bbox, b_bbox = init_params(k_p, in_channels, num_classes)

    # One-time param fusion + bf16 cast (hoisted out of the per-call path).
    w_fused, b_fused, nc, nb = fuse_params(w_cls, b_cls, w_bbox, b_bbox,
                                           dtype=jnp.bfloat16)

    fwd = jax.jit(lambda xi: fast_rcnn_predictor(xi, w_fused, b_fused, nc, nb))
    cls_score, bbox_pred = fwd(x)
    jax.block_until_ready((cls_score, bbox_pred))

    # Reference check in plain JAX (f32 weights, f32 activations).
    x2d = x.reshape(N, -1)
    cls_ref = x2d @ w_cls.T + b_cls
    bbox_ref = x2d @ w_bbox.T + b_bbox
    assert cls_score.shape == (N, num_classes)
    assert bbox_pred.shape == (N, num_classes * 2)
    assert cls_score.dtype == jnp.float32 and bbox_pred.dtype == jnp.float32
    # bf16 matmul operands with f32 accumulation -> slightly looser tolerance.
    assert jnp.allclose(cls_score, cls_ref, atol=5e-2, rtol=5e-2)
    assert jnp.allclose(bbox_pred, bbox_ref, atol=5e-2, rtol=5e-2)

    print("KERNEL_OK")
</pallas_src>

<mosaic_0001>
module attributes {stable_mosaic.version = 11 : i64} {
  func.func @_predictor_kernel(%arg0: i32, %arg1: i32, %arg2: memref<2x1024xbf16, #tpu.memory_space<vmem>>, %arg3: memref<1024x128xbf16, #tpu.memory_space<vmem>>, %arg4: memref<1x128xf32, #tpu.memory_space<vmem>>, %arg5: memref<2x128xf32, #tpu.memory_space<vmem>>, %arg6: memref<2x128xf32, #tpu.memory_space<vmem>>) attributes {dimension_semantics = [#tpu.dimension_semantics<parallel>, #tpu.dimension_semantics<arbitrary>], iteration_bounds = array<i64: 1, 1>, scalar_prefetch = 0 : i64, scratch_operands = 1 : i64, tpu.core_type = #tpu.core_type<tc>, window_params = [{transform_indices = @transform_0, window_bounds = array<i64: 2, 1024>}, {pipeline_mode = #tpu.pipeline_mode<synchronous>, transform_indices = @transform_1, window_bounds = array<i64: 1024, 128>}, {pipeline_mode = #tpu.pipeline_mode<synchronous>, transform_indices = @transform_2, window_bounds = array<i64: 1, 128>}, {transform_indices = @transform_3, window_bounds = array<i64: 2, 128>}]} {
    %c0_i32 = arith.constant 0 : i32
    %0 = arith.cmpi eq, %arg1, %c0_i32 : i32
    %1 = arith.extui %0 : i1 to i32
    %c0_i32_0 = arith.constant 0 : i32
    %2 = arith.cmpi ne, %1, %c0_i32_0 : i32
    scf.if %2 {
      %cst_10 = arith.constant 0.000000e+00 : f32
      %12 = vector.broadcast %cst_10 : f32 to vector<2x128xf32>
      %c0_11 = arith.constant 0 : index
      %c0_12 = arith.constant 0 : index
      %13 = vector.load %arg6[%c0_11, %c0_12] : memref<2x128xf32, #tpu.memory_space<vmem>>, vector<2x128xf32>
      tpu.vector_store %arg6[%c0_11, %c0_12], %12 {strides = array<i32>} : memref<2x128xf32, #tpu.memory_space<vmem>>, vector<2x128xf32>,
    } else {
    }
    %c0 = arith.constant 0 : index
    %c0_1 = arith.constant 0 : index
    %3 = vector.load %arg6[%c0, %c0_1] : memref<2x128xf32, #tpu.memory_space<vmem>>, vector<2x128xf32>
    %c0_2 = arith.constant 0 : index
    %c0_3 = arith.constant 0 : index
    %4 = vector.load %arg2[%c0_2, %c0_3] : memref<2x1024xbf16, #tpu.memory_space<vmem>>, vector<2x1024xbf16>
    %c0_4 = arith.constant 0 : index
    %c0_5 = arith.constant 0 : index
    %5 = vector.load %arg3[%c0_4, %c0_5] : memref<1024x128xbf16, #tpu.memory_space<vmem>>, vector<1024x128xbf16>
    %cst = arith.constant dense<0.000000e+00> : vector<2x128xf32>
    %6 = tpu.matmul %4, %5, %cst {dimension_numbers = #tpu.dot_dimension_numbers<[1], [0], [0], [1], [0, 0, 1, 1], [], []>} : vector<2x1024xbf16>, vector<1024x128xbf16>, vector<2x128xf32> -> vector<2x128xf32>
    %7 = arith.addf %3, %6 : vector<2x128xf32>
    %c0_6 = arith.constant 0 : index
    %c0_7 = arith.constant 0 : index
    %8 = vector.load %arg6[%c0_6, %c0_7] : memref<2x128xf32, #tpu.memory_space<vmem>>, vector<2x128xf32>
    tpu.vector_store %arg6[%c0_6, %c0_7], %7 {strides = array<i32>} : memref<2x128xf32, #tpu.memory_space<vmem>>, vector<2x128xf32>,
    %c0_i32_8 = arith.constant 0 : i32
    %9 = arith.cmpi eq, %arg1, %c0_i32_8 : i32
    %10 = arith.extui %9 : i1 to i32
    %c0_i32_9 = arith.constant 0 : i32
    %11 = arith.cmpi ne, %10, %c0_i32_9 : i32
    scf.if %11 {
      %c0_10 = arith.constant 0 : index
      %c0_11 = arith.constant 0 : index
      %12 = vector.load %arg6[%c0_10, %c0_11] : memref<2x128xf32, #tpu.memory_space<vmem>>, vector<2x128xf32>
      %c0_12 = arith.constant 0 : index
      %c0_13 = arith.constant 0 : index
      %13 = vector.load %arg4[%c0_12, %c0_13] : memref<1x128xf32, #tpu.memory_space<vmem>>, vector<1x128xf32>
      %14 = vector.broadcast %13 : vector<1x128xf32> to vector<2x128xf32>
      %15 = arith.addf %12, %14 : vector<2x128xf32>
      %c0_14 = arith.constant 0 : index
      %c0_15 = arith.constant 0 : index
      %16 = vector.load %arg5[%c0_14, %c0_15] : memref<2x128xf32, #tpu.memory_space<vmem>>, vector<2x128xf32>
      tpu.vector_store %arg5[%c0_14, %c0_15], %15 {strides = array<i32>} : memref<2x128xf32, #tpu.memory_space<vmem>>, vector<2x128xf32>,
    } else {
    }
    return
  }
  func.func @transform_0(%arg0: i32, %arg1: i32) -> (i32, i32) {
    %c0_i32 = arith.constant 0 : i32
    return %arg0, %arg1 : i32, i32
  }
  func.func @transform_1(%arg0: i32, %arg1: i32) -> (i32, i32) {
    %c0_i32 = arith.constant 0 : i32
    %c0_i32_0 = arith.constant 0 : i32
    return %arg1, %c0_i32 : i32, i32
  }
  func.func @transform_2(%arg0: i32, %arg1: i32) -> (i32, i32) {
    %c0_i32 = arith.constant 0 : i32
    %c0_i32_0 = arith.constant 0 : i32
    %c0_i32_1 = arith.constant 0 : i32
    return %c0_i32, %c0_i32_0 : i32, i32
  }
  func.func @transform_3(%arg0: i32, %arg1: i32) -> (i32, i32) {
    %c0_i32 = arith.constant 0 : i32
    %c0_i32_0 = arith.constant 0 : i32
    return %arg0, %c0_i32 : i32, i32
  }
}

</mosaic_0001>

<bundles_post_ra>
// kernel: _lambda_.1
= control target key start
LH: loop header
LB: loop body
LE: loop exit
PB: predicated region body
PF: predicated region fallthrough
CT: control target
= control target key end

     0   :  { %8 = vsyncpa [#allocation4], 0  ;;  %s1031_s12 = smov [#allocation3]   ;;  %s1081_s0 = inlined_call_operand.vmem [shape: bf16[2,1024], index: 0, kind: input, shape index: {}]   ;;  %s1082_s1 = inlined_call_operand.hbm [shape: bf16[1024,128], index: 1, kind: input, shape index: {}]   ;;  %s1083_s2 = inlined_call_operand.vmem [shape: f32[1,128], index: 2, kind: input, shape index: {}]   ;;  %s1084_s3 = inlined_call_operand.vmem [shape: f32[2,128], index: 3, kind: output, shape index: {}]  }
   0x1   :  { %s16_s13 = sshll.u32 %s1031_s12, 4  ;;  %s17_s13 = int_to_ptr.vmem [resolvable:$true] %s16_s13 }
   0x2   :  { %s1017_s14 = scalar_lea.vmem %s17_s13, 8192  ;;  %p1022_p1 = scmp.lt.s32.totalorder %s17_s13, %s17_s13 }
   0x3   :  { %p1018_p0 = scmp.ne.s32.totalorder %s17_s13, %s1017_s14  ;;  %p1023_p2 = scmp.lt.s32.totalorder %s1017_s14, %s1017_s14 }
   0x5   :  { %p1024_p3 = por %p1023_p2, %p1022_p1 }
   0x7   :  { %p1025_p4 = pnand %p1024_p3, %p1018_p0 }
   0x9   :  { %1028 = shalt.err (!%p1025_p4)
}
   0xa   :  { %s1032_s15 = smov 64   ;;  %s1033_s16 = smov 4  }
   0xb   :  { %22 = dma.hbm_to_vmem [thread:$0]  %s1082_s1, 8192, %s17_s13, [#allocation4], %s1032_s15, %s1032_s15, %s1033_s16  }
   0xc   :  { %1029 = dma.done.wait [#allocation4], 8192  }
   0xd   :  { %1030 = vsyncadd [#allocation4], 4294959104  ;;  %v944_v0 = vld [vmem:[#allocation3 + $0x78] sm:$0xff]   ;;  %v948_v4 = vld [vmem:[#allocation3 + $0x70] sm:$0xff]   ;;  %v1034_v22 = vmov 1966171168   ;;  %v169_v24 = vlaneseq }
   0xe   :  { %v945_v1 = vld [vmem:[#allocation3 + $0xf8] sm:$0xff]   ;;  %851 = vmatprep.subr.bf16.mxu0 %v944_v0  ;;  %v949_v5 = vld [vmem:[#allocation3 + $0xf0] sm:$0xff]   ;;  %v952_v8 = vld [vmem:[#allocation3 + $0x68] sm:$0xff]   ;;  %v167_v23 = vunpack.c.l.s4 %v1034_v22 }
   0xf   :  { %v946_v2 = vld [vmem:[#allocation3 + $0x38] sm:$0xff]   ;;  %873 = vmatprep.subr.bf16.mxu1 %v945_v1  ;;  %v950_v6 = vld [vmem:[#allocation3 + $0x30] sm:$0xff]   ;;  %v953_v9 = vld [vmem:[#allocation3 + $0xe8] sm:$0xff]   ;;  %v170_v30 = vshrl.u32 %v169_v24, 7 }
  0x10   :  { %v947_v3 = vld [vmem:[#allocation3 + $0xb8] sm:$0xff]   ;;  %852 = vmatpush3.bf16.msra.mxu0 %v946_v2  ;;  %v951_v7 = vld [vmem:[#allocation3 + $0xb0] sm:$0xff]   ;;  %v954_v10 = vld [vmem:[#allocation3 + $0x28] sm:$0xff]   ;;  %v168_v29 = vunpack.c.0.s8 %v167_v23 }
  0x11   :  { %874 = vmatpush3.bf16.msra.mxu1 %v947_v3  ;;  %853 = vmatprep.subr.bf16.mxu0 %v948_v4  ;;  %v955_v11 = vld [vmem:[#allocation3 + $0xa8] sm:$0xff]   ;;  %v956_v12 = vld [vmem:[#allocation3 + $0x60] sm:$0xff]   ;;  %v960_v16 = vld [vmem:[#allocation3 + $0x58] sm:$0xff]  }
  0x12   :  { %875 = vmatprep.subr.bf16.mxu1 %v949_v5  ;;  %v957_v13 = vld [vmem:[#allocation3 + $0xe0] sm:$0xff]   ;;  %v961_v17 = vld [vmem:[#allocation3 + $0xd8] sm:$0xff]   ;;  %v964_v20 = vld [vmem:[#allocation3 + $0x50] sm:$0xff]   ;;  %v1059_v35 = vsub.s32 %v168_v29, %v170_v30 }
  0x13   :  { %v958_v14 = vld [vmem:[#allocation3 + $0x20] sm:$0xff]   ;;  %v962_v18 = vld [vmem:[#allocation3 + $0x18] sm:$0xff]   ;;  %v965_v21 = vld [vmem:[#allocation3 + $0xd0] sm:$0xff]  }
  0x14   :  { %854 = vmatpush3.bf16.msra.mxu0 %v950_v6  ;;  %v959_v15 = vld [vmem:[#allocation3 + $0xa0] sm:$0xff]   ;;  %v963_v19 = vld [vmem:[#allocation3 + $0x98] sm:$0xff]   ;;  %v966_v25 = vld [vmem:[#allocation3 + $0x10] sm:$0xff]  }
  0x15   :  { %876 = vmatpush3.bf16.msra.mxu1 %v951_v7  ;;  %855 = vmatprep.subr.bf16.mxu0 %v952_v8  ;;  %v967_v26 = vld [vmem:[#allocation3 + $0x90] sm:$0xff]   ;;  %v968_v27 = vld [vmem:[#allocation3 + $0x48] sm:$0xff]   ;;  %v972_v33 = vld [vmem:[#allocation3 + $0x40] sm:$0xff]  }
  0x16   :  { %877 = vmatprep.subr.bf16.mxu1 %v953_v9  ;;  %v969_v28 = vld [vmem:[#allocation3 + $0xc8] sm:$0xff]   ;;  %v973_v34 = vld [vmem:[#allocation3 + $0xc0] sm:$0xff]   ;;  %v977_v41 = vld [vmem:[#allocation3 + $0x178] sm:$0xff]  }
  0x17   :  { %v970_v31 = vld [vmem:[#allocation3 + $0x8] sm:$0xff]   ;;  %v974_v36 = vld [vmem:[#allocation3] sm:$0xff]   ;;  %v978_v42 = vld [vmem:[#allocation3 + $0x1f8] sm:$0xff]  }
  0x18   :  { %856 = vmatpush3.bf16.msra.mxu0 %v954_v10  ;;  %v971_v32 = vld [vmem:[#allocation3 + $0x88] sm:$0xff]   ;;  %v975_v37 = vld [vmem:[#allocation3 + $0x80] sm:$0xff]   ;;  %v979_v47 = vld [vmem:[#allocation3 + $0x138] sm:$0xff]  }
  0x19   :  { %878 = vmatpush3.bf16.msra.mxu1 %v955_v11  ;;  %857 = vmatprep.subr.bf16.mxu0 %v956_v12  ;;  %v35_v38 = vld [vmem:[%s1081_s0] sm:$0xff]  ;;  %v981_v50 = vld [vmem:[#allocation3 + $0x170] sm:$0xff]   ;;  %v985_v57 = vld [vmem:[#allocation3 + $0x168] sm:$0xff]  }
  0x1a   :  { %879 = vmatprep.subr.bf16.mxu1 %v957_v13  ;;  %v165_v39 = vcombine.high %v35_v38, %v35_v38  ;;  %v172_v40 = vrot.slane %v35_v38, %v1059_v35  ;;  %v980_v52 = vld [vmem:[#allocation3 + $0x1b8] sm:$0xff]   ;;  %v982_v54 = vld [vmem:[#allocation3 + $0x1f0] sm:$0xff]   ;;  %v986_v59 = vld [vmem:[#allocation3 + $0x1e8] sm:$0xff]  }
  0x1b   :  { %v983_v55 = vld [vmem:[#allocation3 + $0x130] sm:$0xff]   ;;  %v987_v60 = vld [vmem:[#allocation3 + $0x128] sm:$0xff]   ;;  %v989_v61 = vld [vmem:[#allocation3 + $0x160] sm:$0xff]  }
  0x1c   :  { %858 = vmatpush3.bf16.msra.mxu0 %v958_v14  ;;  %v180_v43 = vcombine.high %v172_v40, %v172_v40  ;;  %v188_v44 = vrot.slane %v172_v40, %v1059_v35  ;;  %v1067_v45 = vrot.slane %v165_v39, %v1059_v35  ;;  %v984_v58 = vld [vmem:[#allocation3 + $0x1b0] sm:$0xff]   ;;  %v988_v62 = vld [vmem:[#allocation3 + $0x1a8] sm:$0xff]   ;;  %v990_v63 = vld [vmem:[#allocation3 + $0x1e0] sm:$0xff]  }
  0x1d   :  { %880 = vmatpush3.bf16.msra.mxu1 %v959_v15  ;;  %859 = vmatprep.subr.bf16.mxu0 %v960_v16  ;;  %v991_v0 = vld [vmem:[#allocation3 + $0x120] sm:$0xff]   ;;  %v993_v1 = vld [vmem:[#allocation3 + $0x158] sm:$0xff]   ;;  %v997_v5 = vld [vmem:[#allocation3 + $0x150] sm:$0xff]  }
  0x1e   :  { %881 = vmatprep.subr.bf16.mxu1 %v961_v17  ;;  %v202_v46 = vrot.slane %v180_v43, %v1059_v35  ;;  %v181_v48 = vcombine.high %v1067_v45, %v1067_v45  ;;  %v210_v49 = vcombine.high %v188_v44, %v188_v44  ;;  %v992_v2 = vld [vmem:[#allocation3 + $0x1a0] sm:$0xff]   ;;  %v994_v3 = vld [vmem:[#allocation3 + $0x1d8] sm:$0xff]   ;;  %v998_v7 = vld [vmem:[#allocation3 + $0x1d0] sm:$0xff]   ;;  %v195_v17 = vrot.slane %v1067_v45, %v1059_v35 }
  0x1f   :  { %v995_v4 = vld [vmem:[#allocation3 + $0x118] sm:$0xff]   ;;  %v999_v8 = vld [vmem:[#allocation3 + $0x110] sm:$0xff]   ;;  %v1001_v9 = vld [vmem:[#allocation3 + $0x148] sm:$0xff]  }
  0x20   :  { %860 = vmatpush3.bf16.msra.mxu0 %v962_v18  ;;  %638 = vmatprep.mubr.bf16.mxu0 %v202_v46  ;;  %v212_v51 = vcombine.high %v202_v46, %v202_v46  ;;  %v209_v53 = vrot.slane %v181_v48, %v1059_v35  ;;  %v996_v6 = vld [vmem:[#allocation3 + $0x198] sm:$0xff]   ;;  %v1000_v10 = vld [vmem:[#allocation3 + $0x190] sm:$0xff]   ;;  %v1002_v11 = vld [vmem:[#allocation3 + $0x1c8] sm:$0xff]  }
  0x21   :  { %882 = vmatpush3.bf16.msra.mxu1 %v963_v19  ;;  %861 = vmatprep.subr.bf16.mxu0 %v964_v20  ;;  %v1003_v12 = vld [vmem:[#allocation3 + $0x108] sm:$0xff]   ;;  %v1005_v13 = vld [vmem:[#allocation3 + $0x140] sm:$0xff]   ;;  %v211_v19 = vcombine.high %v195_v17, %v195_v17  ;;  %v1035_v20 = vmov 0.0   ;;  %v850_v46 = vld [vmem:[%s1083_s2] ss:$0 sm:$0xff] }
  0x22   :  { %883 = vmatprep.subr.bf16.mxu1 %v965_v21  ;;  %678 = vmatprep.mubr.bf16.mxu1 %v212_v51  ;;  %v213_v56 = vcombine.high %v209_v53, %v209_v53  ;;  %v1004_v14 = vld [vmem:[#allocation3 + $0x188] sm:$0xff]   ;;  %v1006_v15 = vld [vmem:[#allocation3 + $0x1c0] sm:$0xff]   ;;  %33 = vst [vmem:[#allocation2] sm:$0x3] %v1035_v20 }
  0x23   :  { %v1007_v16 = vld [vmem:[#allocation3 + $0x100] sm:$0xff]  }
  0x24   :  { %862 = vmatpush3.bf16.msra.mxu0 %v966_v25  ;;  %v1008_v18 = vld [vmem:[#allocation3 + $0x180] sm:$0xff]  }
  0x25   :  { %884 = vmatpush3.bf16.msra.mxu1 %v967_v26  ;;  %863 = vmatprep.subr.bf16.mxu0 %v968_v27 }
  0x26   :  { %885 = vmatprep.subr.bf16.mxu1 %v969_v28 }
  0x28   :  { %864 = vmatpush3.bf16.msra.mxu0 %v970_v31 }
  0x29   :  { %886 = vmatpush3.bf16.msra.mxu1 %v971_v32  ;;  %865 = vmatprep.subr.bf16.mxu0 %v972_v33  ;;  %v34_v40 = vld [vmem:[#allocation2] sm:$0x3] }
  0x2a   :  { %887 = vmatprep.subr.bf16.mxu1 %v973_v34 }
  0x2c   :  { %866 = vmatpush3.bf16.msra.mxu0 %v974_v36 }
  0x2d   :  { %888 = vmatpush3.bf16.msra.mxu1 %v975_v37  ;;  %895 = vmatprep.subr.bf16.mxu0 %v977_v41 }
  0x2e   :  { %917 = vmatprep.subr.bf16.mxu1 %v978_v42 }
  0x2f   :  { %639 = vmatmul.mubr.bf16.vlgmr.msra.gmra.mxu0 %v188_v44 }
  0x30   :  { %896 = vmatpush3.bf16.msra.mxu0 %v979_v47  ;;  %679 = vmatmul.mubr.bf16.vlgmr.msra.gmra.mxu1 %v210_v49 }
  0x31   :  { %897 = vmatprep.subr.bf16.mxu0 %v981_v50  ;;  %918 = vmatpush3.bf16.msra.mxu1 %v980_v52 }
  0x32   :  { %718 = vmatprep.mubr.bf16.mxu0 %v209_v53  ;;  %919 = vmatprep.subr.bf16.mxu1 %v982_v54 }
  0x33   :  { %758 = vmatprep.mubr.bf16.mxu1 %v213_v56 }
  0x34   :  { %898 = vmatpush3.bf16.msra.mxu0 %v983_v55 }
  0x35   :  { %899 = vmatprep.subr.bf16.mxu0 %v985_v57  ;;  %920 = vmatpush3.bf16.msra.mxu1 %v984_v58 }
  0x36   :  { %921 = vmatprep.subr.bf16.mxu1 %v986_v59 }
  0x38   :  { %900 = vmatpush3.bf16.msra.mxu0 %v987_v60 }
  0x39   :  { %901 = vmatprep.subr.bf16.mxu0 %v989_v61  ;;  %922 = vmatpush3.bf16.msra.mxu1 %v988_v62 }
  0x3a   :  { %923 = vmatprep.subr.bf16.mxu1 %v990_v63 }
  0x3c   :  { %902 = vmatpush3.bf16.msra.mxu0 %v991_v0 }
  0x3d   :  { %903 = vmatprep.subr.bf16.mxu0 %v993_v1  ;;  %924 = vmatpush3.bf16.msra.mxu1 %v992_v2 }
  0x3e   :  { %925 = vmatprep.subr.bf16.mxu1 %v994_v3 }
  0x40   :  { %904 = vmatpush3.bf16.msra.mxu0 %v995_v4 }
  0x41   :  { %905 = vmatprep.subr.bf16.mxu0 %v997_v5  ;;  %926 = vmatpush3.bf16.msra.mxu1 %v996_v6 }
  0x42   :  { %927 = vmatprep.subr.bf16.mxu1 %v998_v7 }
  0x44   :  { %906 = vmatpush3.bf16.msra.mxu0 %v999_v8 }
  0x45   :  { %907 = vmatprep.subr.bf16.mxu0 %v1001_v9  ;;  %928 = vmatpush3.bf16.msra.mxu1 %v1000_v10 }
  0x46   :  { %929 = vmatprep.subr.bf16.mxu1 %v1002_v11 }
  0x48   :  { %908 = vmatpush3.bf16.msra.mxu0 %v1003_v12 }
  0x49   :  { %909 = vmatprep.subr.bf16.mxu0 %v1005_v13  ;;  %930 = vmatpush3.bf16.msra.mxu1 %v1004_v14 }
  0x4a   :  { %931 = vmatprep.subr.bf16.mxu1 %v1006_v15 }
  0x4c   :  { %910 = vmatpush3.bf16.msra.mxu0 %v1007_v16 }
  0x4d   :  { %932 = vmatpush3.bf16.msra.mxu1 %v1008_v18 }
  0x4f   :  { %719 = vmatmul.mubr.bf16.vlgmr.msra.gmra.mxu0 %v195_v17 }
  0x50   :  { %759 = vmatmul.mubr.bf16.vlgmr.msra.gmra.mxu1 %v211_v19 }
  0xef   :  { %v867_v21 = vpop.f32.mrf.mxu0 }
  0xf0   :  { %v889_v22 = vpop.f32.mrf.mxu1 }
  0xf1   :  { %v868_v23 = vpop.f32.mrf.mxu0 }
  0xf2   :  { %v890_v24 = vpop.f32.mrf.mxu1  ;;  %v869_v29 = vadd.f32 %v868_v23, %v867_v21 }
  0xf3   :  { %v870_v25 = vpop.f32.mrf.mxu0  ;;  %v891_v30 = vadd.f32 %v890_v24, %v889_v22 }
  0xf4   :  { %v892_v26 = vpop.f32.mrf.mxu1 }
  0xf5   :  { %v871_v27 = vpop.f32.mrf.mxu0  ;;  %v681_v34 = vadd.f32 %v891_v30, %v869_v29 }
  0xf6   :  { %v893_v28 = vpop.f32.mrf.mxu1 }
 0x10f   :  { %v911_v31 = vpop.f32.mrf.mxu0 }
 0x110   :  { %v933_v32 = vpop.f32.mrf.mxu1 }
 0x111   :  { %v912_v33 = vpop.f32.mrf.mxu0 }
 0x112   :  { %v913_v35 = vadd.f32 %v912_v33, %v911_v31  ;;  %v934_v36 = vpop.f32.mrf.mxu1 }
 0x113   :  { %v914_v37 = vpop.f32.mrf.mxu0  ;;  %v935_v39 = vadd.f32 %v934_v36, %v933_v32 }
 0x114   :  { %v721_v38 = vadd.f32 %v913_v35, %v681_v34  ;;  %v936_v41 = vpop.f32.mrf.mxu1 }
 0x115   :  { %v915_v42 = vpop.f32.mrf.mxu0 }
 0x116   :  { %v761_v43 = vadd.f32 %v935_v39, %v721_v38  ;;  %v937_v44 = vpop.f32.mrf.mxu1 }
 0x118   :  { %v766_v45 = vadd.f32 %v761_v43, %v34_v40 }
 0x11a   :  { %767 = vst [vmem:[#allocation2] sm:$0x3] %v766_v45 }
 0x121   :  { %v771_v47 = vld [vmem:[#allocation2] sm:$0x3] }
 0x122   :  { %v779_v48 = vadd.f32 %v850_v46, %v771_v47 }
 0x124   :  { %780 = vst [vmem:[%s1084_s3] sm:$0x3] %v779_v48 }
 0x125   :  { %785 = vsyncpa [#allocation4], 1 }

</bundles_post_ra>
